<compile_context>
chip_gen: v7x
topology: tpu7x:2x2x1
jax: 0.10.0
libtpu: 0.0.40
codegen_flags: <defaults>
</compile_context>

<pallas_src>
import functools

import jax
import jax.numpy as jnp
import numpy as np
from jax.experimental import pallas as pl
from jax.experimental.pallas import tpu as pltpu

EPS = 1e-5  # nn.BatchNorm1d default eps


def _round_up(v, m):
    return (v + m - 1) // m * m


def _residual_block_kernel(xe_ref, xo_ref, w1s_ref, w2s_ref, pv_ref, out_ref, *,
                           lout, m_valid, cout_p):
    inv_m = 1.0 / float(m_valid)
    mp = out_ref.shape[1]

    # One lane-index row reused for every boundary / validity mask.
    lane = jax.lax.broadcasted_iota(jnp.int32, (1, mp), 1)
    j = lane % lout
    is_first = j == 0                                  # j == 0 of each sample (also col M)
    is_last = (j == lout - 1) | (lane >= m_valid)
    valid = lane < m_valid

    t1 = xe_ref[...]                                   # (Cin_p, Mp)  x[2j]   (center + skip tap)
    t2 = xo_ref[...]                                   # (Cin_p, Mp)  x[2j+1] (right tap)
    # Left tap x[2j-1] = x_odd[j-1]: lane rotation + per-sample left-edge mask.
    t0 = jnp.where(is_first, 0.0, pltpu.roll(t2, shift=1, axis=1))

    # ---- conv1 (k=3, stride=2, pad=1) + skip conv (k=1, stride=2): one MXU matmul ----
    taps = jnp.concatenate([t0, t1, t2], axis=0)                        # (3*Cin_p, Mp)
    res = jnp.dot(w1s_ref[...], taps, preferred_element_type=jnp.float32,
                  precision=jax.lax.Precision.HIGHEST)                  # (2*Cout_p, Mp)
    h_pre = res[:cout_p, :]      # conv1 pre-BN (b1 dropped: cancelled by BN mean)
    ident = res[cout_p:, :]      # skip conv pre-bias

    pv = pv_ref[...]             # (Cout_p, 8): [g1, be1, g2, be2, bs, 0, 0, 0]
    g1, be1 = pv[:, 0:1], pv[:, 1:2]
    g2, be2 = pv[:, 2:3], pv[:, 3:4]
    bs = pv[:, 4:5]

    # ---- bn1 folded into per-channel scale/shift (one-pass sum / sumsq) --------------
    # Lane-padding columns of h_pre are exactly zero (zero taps, no bias), so sums over
    # the padded slab equal sums over the m_valid real columns.
    m1 = jnp.sum(h_pre, axis=1, keepdims=True) * inv_m
    v1 = jnp.maximum(jnp.sum(h_pre * h_pre, axis=1, keepdims=True) * inv_m - m1 * m1, 0.0)
    a1 = g1 * jax.lax.rsqrt(v1 + EPS)
    c1 = be1 - m1 * a1

    # ReLU; also zero the lane-padding columns so they stay inert through conv2/bn2.
    h = jnp.where(valid, jnp.maximum(h_pre * a1 + c1, 0.0), 0.0)

    # ---- conv2 (k=3, stride=1, pad=1): roll + boundary masks, one stacked matmul -----
    left = jnp.where(is_first, 0.0, pltpu.roll(h, shift=1, axis=1))
    right = jnp.where(is_last, 0.0, pltpu.roll(h, shift=mp - 1, axis=1))
    taps2 = jnp.concatenate([left, h, right], axis=0)                   # (3*Cout_p, Mp)
    h2 = jnp.dot(w2s_ref[...], taps2, preferred_element_type=jnp.float32,
                 precision=jax.lax.Precision.HIGHEST)                   # (Cout_p, Mp)

    # ---- bn2 (padding columns of h2 are exactly zero by construction) ----------------
    m2 = jnp.sum(h2, axis=1, keepdims=True) * inv_m
    v2 = jnp.maximum(jnp.sum(h2 * h2, axis=1, keepdims=True) * inv_m - m2 * m2, 0.0)
    a2 = g2 * jax.lax.rsqrt(v2 + EPS)
    c2 = be2 - m2 * a2

    # ---- residual add + relu ----------------------------------------------------------
    out_ref[...] = jnp.maximum(h2 * a2 + c2 + ident + bs, 0.0)


def residual_block_pallas(x, params):
    """x: (N, C_in, L) float32 -> (N, C_out, (L+1)//2) float32."""
    N, Cin, L = x.shape
    Cout = params["w1"].shape[0]
    Lout = (L - 1) // 2 + 1          # Conv1d(k=3, s=2, p=1) output length
    M = N * Lout
    Mp = _round_up(M, 128)           # lane-dense output
    Cin_p = _round_up(Cin, 8)        # sublane alignment
    Cout_p = _round_up(Cout, 8)

    # Deinterleave the input once: even taps x[2j] and odd taps x[2j+1]; no duplication.
    xp = jnp.pad(x.astype(jnp.float32), ((0, 0), (0, 0), (0, 2 * Lout - L)))
    xe = xp[:, :, 0::2]              # (N, Cin, Lout)
    xo = xp[:, :, 1::2]

    def slab(t):                     # (N, Cin, Lout) -> (Cin_p, Mp), zero padded
        s = jnp.transpose(t, (1, 0, 2)).reshape(Cin, M)
        return jnp.pad(s, ((0, Cin_p - Cin), (0, Mp - M)))

    xe_s, xo_s = slab(xe), slab(xo)

    def pad_cc(w, rows, cols):
        return jnp.pad(w.astype(jnp.float32),
                       ((0, rows - w.shape[0]), (0, cols - w.shape[1])))

    # Fused conv1 + skip weight: (2*Cout_p, 3*Cin_p); skip sits in the center-tap block.
    w1 = params["w1"]                # (Cout, Cin, 3)
    ws = params["ws"][:, :, 0]       # (Cout, Cin)
    w1_top = jnp.concatenate([pad_cc(w1[:, :, k], Cout_p, Cin_p) for k in range(3)], axis=1)
    zeros_blk = jnp.zeros((Cout_p, Cin_p), jnp.float32)
    w1_skip = jnp.concatenate([zeros_blk, pad_cc(ws, Cout_p, Cin_p), zeros_blk], axis=1)
    w1s = jnp.concatenate([w1_top, w1_skip], axis=0)          # (2*Cout_p, 3*Cin_p)

    w2 = params["w2"]                # (Cout, Cout, 3)
    w2s = jnp.concatenate([pad_cc(w2[:, :, k], Cout_p, Cout_p) for k in range(3)], axis=1)

    # Single per-channel parameter slab: [g1, be1, g2, be2, bs, 0, 0, 0].
    # b1/b2 intentionally dropped: exactly cancelled by the BN mean subtraction.
    pv = jnp.stack([params["g1"], params["be1"], params["g2"], params["be2"],
                    params["bs"]], axis=1).astype(jnp.float32)           # (Cout, 5)
    pv = jnp.pad(pv, ((0, Cout_p - Cout), (0, 8 - pv.shape[1])))         # (Cout_p, 8)

    flops = 2 * Mp * (2 * Cout_p * 3 * Cin_p + Cout_p * 3 * Cout_p) + 16 * Cout_p * Mp
    bytes_accessed = 4 * (2 * Cin_p * Mp + Cout_p * Mp
                          + 2 * Cout_p * 3 * Cin_p + Cout_p * 3 * Cout_p + Cout_p * 8)

    kernel = functools.partial(_residual_block_kernel,
                               lout=Lout, m_valid=M, cout_p=Cout_p)

    vmem = pl.BlockSpec(memory_space=pltpu.MemorySpace.VMEM)
    out2d = pl.pallas_call(
        kernel,
        out_shape=jax.ShapeDtypeStruct((Cout_p, Mp), jnp.float32),
        in_specs=[vmem] * 5,
        out_specs=vmem,
        cost_estimate=pl.CostEstimate(flops=flops,
                                      transcendentals=2 * Cout_p,
                                      bytes_accessed=bytes_accessed),
    )(xe_s, xo_s, w1s, w2s, pv)

    out = out2d[:Cout, :M].reshape(Cout, N, Lout)
    return jnp.transpose(out, (1, 0, 2))                      # (N, Cout, Lout)


def residual_block_reference(x, params):
    """Pure-JAX reference with identical (train-mode BN) semantics."""
    def conv1d(x, w, b, stride, pad):
        y = jax.lax.conv_general_dilated(
            x, w, window_strides=(stride,), padding=[(pad, pad)],
            dimension_numbers=("NCH", "OIH", "NCH"),
            precision=jax.lax.Precision.HIGHEST)
        return y + b[None, :, None]

    def bn(y, g, be):
        m = jnp.mean(y, axis=(0, 2), keepdims=True)
        v = jnp.mean((y - m) ** 2, axis=(0, 2), keepdims=True)
        return (y - m) / jnp.sqrt(v + EPS) * g[None, :, None] + be[None, :, None]

    ident = conv1d(x, params["ws"], params["bs"], 2, 0)
    out = conv1d(x, params["w1"], params["b1"], 2, 1)
    out = jnp.maximum(bn(out, params["g1"], params["be1"]), 0.0)
    out = conv1d(out, params["w2"], params["b2"], 1, 1)
    out = bn(out, params["g2"], params["be2"])
    return jnp.maximum(out + ident, 0.0)


if __name__ == "__main__":
    N, Cin, Cout, L = 2, 4, 8, 16
    key = jax.random.PRNGKey(0)
    ks = jax.random.split(key, 11)
    params = {
        "w1": 0.3 * jax.random.normal(ks[0], (Cout, Cin, 3), jnp.float32),
        "b1": 0.1 * jax.random.normal(ks[1], (Cout,), jnp.float32),
        "g1": 1.0 + 0.1 * jax.random.normal(ks[2], (Cout,), jnp.float32),
        "be1": 0.1 * jax.random.normal(ks[3], (Cout,), jnp.float32),
        "w2": 0.3 * jax.random.normal(ks[4], (Cout, Cout, 3), jnp.float32),
        "b2": 0.1 * jax.random.normal(ks[5], (Cout,), jnp.float32),
        "g2": 1.0 + 0.1 * jax.random.normal(ks[6], (Cout,), jnp.float32),
        "be2": 0.1 * jax.random.normal(ks[7], (Cout,), jnp.float32),
        "ws": 0.3 * jax.random.normal(ks[8], (Cout, Cin, 1), jnp.float32),
        "bs": 0.1 * jax.random.normal(ks[9], (Cout,), jnp.float32),
    }
    x = jax.random.normal(ks[10], (N, Cin, L), jnp.float32)

    fwd = jax.jit(residual_block_pallas)
    out = jax.block_until_ready(fwd(x, params))
    ref = jax.block_until_ready(residual_block_reference(x, params))

    assert out.shape == (N, Cout, (L + 1) // 2), out.shape
    np.testing.assert_allclose(np.asarray(out), np.asarray(ref), rtol=1.5e-3, atol=1.5e-3)
    print("KERNEL_OK")
</pallas_src>

<mosaic_0001>
module attributes {stable_mosaic.version = 11 : i64} {
  func.func @_residual_block_kernel(%arg0: memref<8x128xf32, #tpu.memory_space<vmem>>, %arg1: memref<8x128xf32, #tpu.memory_space<vmem>>, %arg2: memref<16x24xf32, #tpu.memory_space<vmem>>, %arg3: memref<8x24xf32, #tpu.memory_space<vmem>>, %arg4: memref<8x8xf32, #tpu.memory_space<vmem>>, %arg5: memref<8x128xf32, #tpu.memory_space<vmem>>) attributes {dimension_semantics = [], scalar_prefetch = 0 : i64, scratch_operands = 0 : i64, tpu.core_type = #tpu.core_type<tc>} {
    %0 = tpu.iota {dimensions = array<i32: 1>} : vector<1x128xi32>
    %c8_i32 = arith.constant 8 : i32
    %c0_i32 = arith.constant 0 : i32
    %1 = arith.cmpi eq, %c8_i32, %c0_i32 : i32
    %c1_i32 = arith.constant 1 : i32
    %2 = arith.select %1, %c1_i32, %c8_i32 : i32
    %3 = vector.broadcast %2 : i32 to vector<1x128xi32>
    %4 = arith.remsi %0, %3 : vector<1x128xi32>
    %c0_i32_0 = arith.constant 0 : i32
    %5 = vector.broadcast %c0_i32_0 : i32 to vector<1x128xi32>
    %6 = arith.cmpi ne, %4, %5 : vector<1x128xi32>
    %c0_i32_1 = arith.constant 0 : i32
    %7 = vector.broadcast %c0_i32_1 : i32 to vector<1x128xi32>
    %8 = arith.cmpi slt, %4, %7 : vector<1x128xi32>
    %c0_i32_2 = arith.constant 0 : i32
    %9 = arith.cmpi slt, %2, %c0_i32_2 : i32
    %10 = vector.broadcast %9 : i1 to vector<1x128xi1>
    %11 = vector.broadcast %10 : vector<1x128xi1> to vector<1x128xi1>
    %12 = arith.xori %8, %11 : vector<1x128xi1>
    %13 = arith.andi %12, %6 : vector<1x128xi1>
    %14 = vector.broadcast %2 : i32 to vector<1x128xi32>
    %15 = arith.addi %4, %14 : vector<1x128xi32>
    %16 = arith.select %13, %15, %4 : vector<1x128xi1>, vector<1x128xi32>
    %c0_i32_3 = arith.constant 0 : i32
    %17 = vector.broadcast %c0_i32_3 : i32 to vector<1x128xi32>
    %18 = arith.cmpi eq, %16, %17 : vector<1x128xi32>
    %c7_i32 = arith.constant 7 : i32
    %19 = vector.broadcast %c7_i32 : i32 to vector<1x128xi32>
    %20 = arith.cmpi eq, %16, %19 : vector<1x128xi32>
    %c16_i32 = arith.constant 16 : i32
    %21 = vector.broadcast %c16_i32 : i32 to vector<1x128xi32>
    %22 = arith.cmpi sge, %0, %21 : vector<1x128xi32>
    %23 = arith.ori %20, %22 : vector<1x128xi1>
    %c16_i32_4 = arith.constant 16 : i32
    %24 = vector.broadcast %c16_i32_4 : i32 to vector<1x128xi32>
    %25 = arith.cmpi slt, %0, %24 : vector<1x128xi32>
    %c0 = arith.constant 0 : index
    %c0_5 = arith.constant 0 : index
    %26 = vector.load %arg0[%c0, %c0_5] : memref<8x128xf32, #tpu.memory_space<vmem>>, vector<8x128xf32>
    %c0_6 = arith.constant 0 : index
    %c0_7 = arith.constant 0 : index
    %27 = vector.load %arg1[%c0_6, %c0_7] : memref<8x128xf32, #tpu.memory_space<vmem>>, vector<8x128xf32>
    %c1_i32_8 = arith.constant 1 : i32
    %28 = tpu.dynamic_rotate %27 by %c1_i32_8 dim 1 : vector<8x128xf32>, i32 -> vector<8x128xf32>
    %cst = arith.constant 0.000000e+00 : f32
    %29 = vector.shape_cast %18 : vector<1x128xi1> to vector<1x128xi1>
    %30 = vector.broadcast %29 : vector<1x128xi1> to vector<8x128xi1>
    %31 = vector.broadcast %cst : f32 to vector<8x128xf32>
    %32 = arith.select %30, %31, %28 : vector<8x128xi1>, vector<8x128xf32>
    %33 = tpu.concatenate %32, %26, %27 in 0 : vector<8x128xf32>, vector<8x128xf32>, vector<8x128xf32> -> vector<24x128xf32>
    %c0_9 = arith.constant 0 : index
    %c0_10 = arith.constant 0 : index
    %34 = vector.load %arg2[%c0_9, %c0_10] : memref<16x24xf32, #tpu.memory_space<vmem>>, vector<16x24xf32>
    %cst_11 = arith.constant dense<0.000000e+00> : vector<16x128xf32>
    %35 = tpu.matmul %34, %33, %cst_11 {dimension_numbers = #tpu.dot_dimension_numbers<[1], [0], [0], [1], [0, 0, 1, 1], [], []>, precision = #tpu.contract_precision<fp32>} : vector<16x24xf32>, vector<24x128xf32>, vector<16x128xf32> -> vector<16x128xf32>
    %36 = vector.extract_strided_slice %35 {offsets = [0, 0], sizes = [8, 128], strides = [1, 1]} : vector<16x128xf32> to vector<8x128xf32>
    %37 = vector.extract_strided_slice %35 {offsets = [8, 0], sizes = [8, 128], strides = [1, 1]} : vector<16x128xf32> to vector<8x128xf32>
    %c0_12 = arith.constant 0 : index
    %c0_13 = arith.constant 0 : index
    %38 = vector.load %arg4[%c0_12, %c0_13] : memref<8x8xf32, #tpu.memory_space<vmem>>, vector<8x8xf32>
    %39 = vector.extract_strided_slice %38 {offsets = [0, 0], sizes = [8, 1], strides = [1, 1]} : vector<8x8xf32> to vector<8x1xf32>
    %40 = vector.extract_strided_slice %38 {offsets = [0, 1], sizes = [8, 1], strides = [1, 1]} : vector<8x8xf32> to vector<8x1xf32>
    %41 = vector.extract_strided_slice %38 {offsets = [0, 2], sizes = [8, 1], strides = [1, 1]} : vector<8x8xf32> to vector<8x1xf32>
    %42 = vector.extract_strided_slice %38 {offsets = [0, 3], sizes = [8, 1], strides = [1, 1]} : vector<8x8xf32> to vector<8x1xf32>
    %43 = vector.extract_strided_slice %38 {offsets = [0, 4], sizes = [8, 1], strides = [1, 1]} : vector<8x8xf32> to vector<8x1xf32>
    %cst_14 = arith.constant dense<0.000000e+00> : vector<8xf32>
    %44 = vector.multi_reduction <add>, %36, %cst_14 [1] : vector<8x128xf32> to vector<8xf32>
    %45 = vector.shape_cast %44 : vector<8xf32> to vector<8x1xf32>
    %cst_15 = arith.constant 6.250000e-02 : f32
    %46 = vector.broadcast %cst_15 : f32 to vector<8x1xf32>
    %47 = arith.mulf %45, %46 : vector<8x1xf32>
    %48 = arith.mulf %36, %36 : vector<8x128xf32>
    %cst_16 = arith.constant dense<0.000000e+00> : vector<8xf32>
    %49 = vector.multi_reduction <add>, %48, %cst_16 [1] : vector<8x128xf32> to vector<8xf32>
    %50 = vector.shape_cast %49 : vector<8xf32> to vector<8x1xf32>
    %cst_17 = arith.constant 6.250000e-02 : f32
    %51 = vector.broadcast %cst_17 : f32 to vector<8x1xf32>
    %52 = arith.mulf %50, %51 : vector<8x1xf32>
    %53 = arith.mulf %47, %47 : vector<8x1xf32>
    %54 = arith.subf %52, %53 : vector<8x1xf32>
    %cst_18 = arith.constant 0.000000e+00 : f32
    %55 = vector.broadcast %cst_18 : f32 to vector<8x1xf32>
    %56 = arith.maximumf %54, %55 : vector<8x1xf32>
    %cst_19 = arith.constant 9.99999974E-6 : f32
    %57 = vector.broadcast %cst_19 : f32 to vector<8x1xf32>
    %58 = arith.addf %56, %57 : vector<8x1xf32>
    %59 = math.rsqrt %58 : vector<8x1xf32>
    %60 = arith.mulf %39, %59 : vector<8x1xf32>
    %61 = arith.mulf %47, %60 : vector<8x1xf32>
    %62 = arith.subf %40, %61 : vector<8x1xf32>
    %63 = vector.broadcast %60 : vector<8x1xf32> to vector<8x128xf32>
    %64 = arith.mulf %36, %63 : vector<8x128xf32>
    %65 = vector.broadcast %62 : vector<8x1xf32> to vector<8x128xf32>
    %66 = arith.addf %64, %65 : vector<8x128xf32>
    %cst_20 = arith.constant 0.000000e+00 : f32
    %67 = vector.broadcast %cst_20 : f32 to vector<8x128xf32>
    %68 = arith.maximumf %66, %67 : vector<8x128xf32>
    %cst_21 = arith.constant 0.000000e+00 : f32
    %69 = vector.shape_cast %25 : vector<1x128xi1> to vector<1x128xi1>
    %70 = vector.broadcast %69 : vector<1x128xi1> to vector<8x128xi1>
    %71 = vector.broadcast %cst_21 : f32 to vector<8x128xf32>
    %72 = arith.select %70, %68, %71 : vector<8x128xi1>, vector<8x128xf32>
    %c1_i32_22 = arith.constant 1 : i32
    %73 = tpu.dynamic_rotate %72 by %c1_i32_22 dim 1 : vector<8x128xf32>, i32 -> vector<8x128xf32>
    %cst_23 = arith.constant 0.000000e+00 : f32
    %74 = vector.shape_cast %18 : vector<1x128xi1> to vector<1x128xi1>
    %75 = vector.broadcast %74 : vector<1x128xi1> to vector<8x128xi1>
    %76 = vector.broadcast %cst_23 : f32 to vector<8x128xf32>
    %77 = arith.select %75, %76, %73 : vector<8x128xi1>, vector<8x128xf32>
    %c127_i32 = arith.constant 127 : i32
    %78 = tpu.dynamic_rotate %72 by %c127_i32 dim 1 : vector<8x128xf32>, i32 -> vector<8x128xf32>
    %cst_24 = arith.constant 0.000000e+00 : f32
    %79 = vector.shape_cast %23 : vector<1x128xi1> to vector<1x128xi1>
    %80 = vector.broadcast %79 : vector<1x128xi1> to vector<8x128xi1>
    %81 = vector.broadcast %cst_24 : f32 to vector<8x128xf32>
    %82 = arith.select %80, %81, %78 : vector<8x128xi1>, vector<8x128xf32>
    %83 = tpu.concatenate %77, %72, %82 in 0 : vector<8x128xf32>, vector<8x128xf32>, vector<8x128xf32> -> vector<24x128xf32>
    %c0_25 = arith.constant 0 : index
    %c0_26 = arith.constant 0 : index
    %84 = vector.load %arg3[%c0_25, %c0_26] : memref<8x24xf32, #tpu.memory_space<vmem>>, vector<8x24xf32>
    %cst_27 = arith.constant dense<0.000000e+00> : vector<8x128xf32>
    %85 = tpu.matmul %84, %83, %cst_27 {dimension_numbers = #tpu.dot_dimension_numbers<[1], [0], [0], [1], [0, 0, 1, 1], [], []>, precision = #tpu.contract_precision<fp32>} : vector<8x24xf32>, vector<24x128xf32>, vector<8x128xf32> -> vector<8x128xf32>
    %cst_28 = arith.constant dense<0.000000e+00> : vector<8xf32>
    %86 = vector.multi_reduction <add>, %85, %cst_28 [1] : vector<8x128xf32> to vector<8xf32>
    %87 = vector.shape_cast %86 : vector<8xf32> to vector<8x1xf32>
    %cst_29 = arith.constant 6.250000e-02 : f32
    %88 = vector.broadcast %cst_29 : f32 to vector<8x1xf32>
    %89 = arith.mulf %87, %88 : vector<8x1xf32>
    %90 = arith.mulf %85, %85 : vector<8x128xf32>
    %cst_30 = arith.constant dense<0.000000e+00> : vector<8xf32>
    %91 = vector.multi_reduction <add>, %90, %cst_30 [1] : vector<8x128xf32> to vector<8xf32>
    %92 = vector.shape_cast %91 : vector<8xf32> to vector<8x1xf32>
    %cst_31 = arith.constant 6.250000e-02 : f32
    %93 = vector.broadcast %cst_31 : f32 to vector<8x1xf32>
    %94 = arith.mulf %92, %93 : vector<8x1xf32>
    %95 = arith.mulf %89, %89 : vector<8x1xf32>
    %96 = arith.subf %94, %95 : vector<8x1xf32>
    %cst_32 = arith.constant 0.000000e+00 : f32
    %97 = vector.broadcast %cst_32 : f32 to vector<8x1xf32>
    %98 = arith.maximumf %96, %97 : vector<8x1xf32>
    %cst_33 = arith.constant 9.99999974E-6 : f32
    %99 = vector.broadcast %cst_33 : f32 to vector<8x1xf32>
    %100 = arith.addf %98, %99 : vector<8x1xf32>
    %101 = math.rsqrt %100 : vector<8x1xf32>
    %102 = arith.mulf %41, %101 : vector<8x1xf32>
    %103 = arith.mulf %89, %102 : vector<8x1xf32>
    %104 = arith.subf %42, %103 : vector<8x1xf32>
    %105 = vector.broadcast %102 : vector<8x1xf32> to vector<8x128xf32>
    %106 = arith.mulf %85, %105 : vector<8x128xf32>
    %107 = vector.broadcast %104 : vector<8x1xf32> to vector<8x128xf32>
    %108 = arith.addf %106, %107 : vector<8x128xf32>
    %109 = arith.addf %108, %37 : vector<8x128xf32>
    %110 = vector.broadcast %43 : vector<8x1xf32> to vector<8x128xf32>
    %111 = arith.addf %109, %110 : vector<8x128xf32>
    %cst_34 = arith.constant 0.000000e+00 : f32
    %112 = vector.broadcast %cst_34 : f32 to vector<8x128xf32>
    %113 = arith.maximumf %111, %112 : vector<8x128xf32>
    %c0_35 = arith.constant 0 : index
    %c0_36 = arith.constant 0 : index
    %114 = vector.load %arg5[%c0_35, %c0_36] : memref<8x128xf32, #tpu.memory_space<vmem>>, vector<8x128xf32>
    tpu.vector_store %arg5[%c0_35, %c0_36], %113 {strides = array<i32>} : memref<8x128xf32, #tpu.memory_space<vmem>>, vector<8x128xf32>,
    return
  }
}

</mosaic_0001>

<bundles_post_ra>
// kernel: residual_block_pallas.1
= control target key start
LH: loop header
LB: loop body
LE: loop exit
PB: predicated region body
PF: predicated region fallthrough
CT: control target
= control target key end

     0   :  { %vm48_vm0 = vcmask 195584   ;;  %s1378_s22 = smov 1   ;;  %v20_v8 = vlaneseq  ;;  %v1379_v44 = vmov 0   ;;  %v1380_v57 = vmov 1   ;;  %s1509_s1 = inlined_call_operand.vmem [shape: f32[8,128], index: 1, kind: input, shape index: {}]   ;;  %s1510_s2 = inlined_call_operand.vmem [shape: f32[16,24], index: 2, kind: input, shape index: {}]   ;;  %s1511_s0 = inlined_call_operand.vmem [shape: f32[8,128], index: 0, kind: input, shape index: {}]   ;;  %s1512_s4 = inlined_call_operand.vmem [shape: f32[8,8], index: 4, kind: input, shape index: {}]   ;;  %s1513_s3 = inlined_call_operand.vmem [shape: f32[8,24], index: 3, kind: input, shape index: {}]   ;;  %s1514_s5 = inlined_call_operand.vmem [shape: f32[8,128], index: 5, kind: output, shape index: {}]  }
   0x1   :  { %v40_v0 = vld [vmem:[%s1509_s1] sm:$0xff]  ;;  %v47_v9 = vld [vmem:[%s1510_s2 + $0x8] sm:$0xff]  ;;  %1368 = vset.pattern.permute.xlu1 %v1379_v44  ;;  %v1381_v61 = vmov 0.0|0.0   ;;  %vm1382_vm3 = vmmov 0  }
   0x2   :  { %v46_v1 = vld [vmem:[%s1510_s2] sm:$0xff]  ;;  %41 = vrot.lane.b32.xlu0 %v40_v0, %s1378_s22  ;;  %v53_v11 = vsel %vm48_vm0, %v47_v9, 0  ;;  %v1436_v12 = vand.u32 127, %v20_v8  ;;  %v62_v16 = vand.u32 4294901760, %v40_v0  ;;  %1320 = vmatprep.subr.bf16.mxu1 %v1381_v61 }
   0x3   :  { %v50_v2 = vsel %vm48_vm0, %v46_v1, 0  ;;  %v39_v10 = vld [vmem:[%s1511_s0] sm:$0xff]  ;;  %v133_v14 = vand.u32 4294901760, %v53_v11 }
   0x4   :  { %v1426_v3 = vand.u32 4294901760, %v50_v2  ;;  %v59_v13 = vand.u32 4294901760, %v39_v10  ;;  %v26_v15 = vand.u32 7, %v1436_v12  ;;  %v159_v20 = vsub.f32 %v40_v0, %v62_v16  ;;  %v1455_v53 = vld [vmem:[%s1512_s4] sm:$0xff]  ;;  %s1384_s4 = smov 127  }
   0x5   :  { %v134_v18 = vsub.f32 %v53_v11, %v133_v14  ;;  %vm38_vm2 = vcmp.lt.s32.totalorder %v1436_v12, 16  ;;  %vm36_vm5 = vcmp.ge.s32.totalorder %v1436_v12, 16 }
   0x6   :  { %v124_v4 = vsub.f32 %v50_v2, %v1426_v3  ;;  %v152_v17 = vsub.f32 %v39_v10, %v59_v13  ;;  %vm1441_vm1 = vcmp.eq.s32.totalorder %v26_v15, 0  ;;  %v160_v26 = vand.u32 4294901760, %v159_v20 }
   0x7   :  { %v135_v22 = vand.u32 4294901760, %v134_v18  ;;  %v1383_v2 = vmov 0.0   ;;  %vm35_vm4 = vcmp.eq.s32.totalorder %v26_v15, 7 }
   0x8   :  { %v125_v5 = vand.u32 4294901760, %v124_v4  ;;  %v153_v23 = vand.u32 4294901760, %v152_v17  ;;  %v161_v35 = vsub.f32 %v159_v20, %v160_v26  ;;  %1248 = vmatprep.mubr.msk.f32.mxu1 %vm1382_vm3, %v1383_v2  ;;  %vm37_vm6 = vmor %vm35_vm4, %vm36_vm5 }
   0x9   :  { %v136_v29 = vsub.f32 %v134_v18, %v135_v22 }
   0xa   :  { %v126_v6 = vsub.f32 %v124_v4, %v125_v5  ;;  %v154_v30 = vsub.f32 %v152_v17, %v153_v23  ;;  %v162_v38 = vand.u32 4294901760, %v161_v35 }
   0xb   :  { %v137_v33 = vand.u32 4294901760, %v136_v29 }
   0xc   :  { %v127_v7 = vand.u32 4294901760, %v126_v6  ;;  %v155_v34 = vand.u32 4294901760, %v154_v30 }
   0xe   :  { %1194 = vmatprep.mubr.f32.mxu0 %v127_v7 }
  0x74   :  { %v42_v21 = vpop.permute.xlu0 %41 }
  0x75   :  { %v45_v24 = vsel %vm1441_vm1, 0.0, %v42_v21 }
  0x76   :  { %v56_v25 = vand.u32 4294901760, %v45_v24 }
  0x78   :  { %v1296_v27 = vpack.c.bf16 %v59_v13, %v56_v25  ;;  %v145_v28 = vsub.f32 %v45_v24, %v56_v25 }
  0x7a   :  { %v146_v31 = vand.u32 4294901760, %v145_v28  ;;  %1297 = vmatprep.subr.bf16.mxu0 %v1296_v27  ;;  %v1304_v39 = vpack.c.bf16 %v152_v17, %v145_v28 }
  0x7b   :  { %1299 = vmatpush3.bf16.msra.mxu0 %v1296_v27 }
  0x7c   :  { %v147_v32 = vsub.f32 %v145_v28, %v146_v31  ;;  %1192 = vmatprep.subr.mxu0 %v62_v16  ;;  %v1312_v40 = vpack.c.bf16 %v153_v23, %v146_v31 }
  0x7e   :  { %v148_v36 = vand.u32 4294901760, %v147_v32 }
  0x7f   :  { %1193 = vmatpush3.msra.mxu0 %v62_v16 }
  0x80   :  { %1195 = vmatmul.mubr.f32.vlgmr.msra.gmra.mrb[0].mxu0 %v137_v33  ;;  %v1300_v37 = vpack.c.bf16 %v155_v34, %v148_v36 }
  0x81   :  { %1203 = vmatprep.mubr.f32.mxu0 %v1426_v3 }
  0x82   :  { %1301 = vmatprep.subr.bf16.mxu0 %v1300_v37 }
  0x83   :  { %1303 = vmatpush3.bf16.msra.mxu0 %v1300_v37  ;;  %v1385_v37 = vmov 2  }
  0x84   :  { %1201 = vmatprep.subr.mxu0 %v162_v38  ;;  %1370 = vset.pattern.permute.xlu0 %v1385_v37 }
  0x87   :  { %1202 = vmatpush3.msra.mxu0 %v162_v38 }
  0x88   :  { %1204 = vmatmul.mubr.f32.vlgmr.msra.gmra.mrb[0].mxu0 %v133_v14  ;;  %1305 = vmatprep.subr.bf16.mxu0 %v1304_v39 }
  0x89   :  { %1307 = vmatpush3.bf16.msra.mxu0 %v1304_v39  ;;  %1212 = vmatprep.mubr.f32.mxu0 %v124_v4  ;;  %v614_v4 = vld [vmem:[%s1513_s3] sm:$0xff] }
  0x8a   :  { %1210 = vmatprep.subr.mxu0 %v159_v20 }
  0x8d   :  { %1211 = vmatpush3.msra.mxu0 %v159_v20 }
  0x8e   :  { %1309 = vmatprep.subr.bf16.mxu0 %v1296_v27 }
  0x90   :  { %1213 = vmatmul.mubr.f32.vlgmr.msra.gmra.mrb[0].mxu0 %v134_v18 }
  0x91   :  { %1311 = vmatpush3.bf16.msra.mxu0 %v1296_v27  ;;  %1221 = vmatprep.mubr.f32.mxu0 %v125_v5  ;;  %v616_v5 = vsel %vm48_vm0, %v614_v4, 0 }
  0x92   :  { %1219 = vmatprep.subr.mxu0 %v62_v16  ;;  %v1469_v6 = vand.u32 4294901760, %v616_v5 }
  0x94   :  { %v687_v8 = vsub.f32 %v616_v5, %v1469_v6 }
  0x95   :  { %1220 = vmatpush3.msra.mxu0 %v62_v16 }
  0x96   :  { %1313 = vmatprep.subr.bf16.mxu0 %v1312_v40  ;;  %v688_v10 = vand.u32 4294901760, %v687_v8 }
  0x98   :  { %1222 = vmatmul.mubr.f32.vlgmr.msra.gmra.mrb[0].mxu0 %v135_v22  ;;  %v689_v17 = vsub.f32 %v687_v8, %v688_v10 }
  0x99   :  { %1315 = vmatpush3.bf16.msra.mxu0 %v1312_v40  ;;  %1230 = vmatprep.mubr.f32.mxu0 %v1426_v3 }
  0x9a   :  { %1228 = vmatprep.subr.mxu0 %v160_v26  ;;  %v690_v12 = vand.u32 4294901760, %v689_v17 }
  0x9d   :  { %1229 = vmatpush3.msra.mxu0 %v160_v26 }
  0x9e   :  { %1317 = vmatprep.subr.bf16.mxu0 %v1296_v27 }
  0xa0   :  { %1231 = vmatmul.mubr.f32.vlgmr.msra.gmra.mrb[0].mxu0 %v133_v14 }
  0xa1   :  { %1319 = vmatpush3.bf16.msra.mxu0 %v1296_v27  ;;  %1239 = vmatprep.mubr.f32.mxu0 %v1426_v3 }
  0xa2   :  { %1237 = vmatprep.subr.mxu0 %v62_v16 }
  0xa5   :  { %1238 = vmatpush3.msra.mxu0 %v62_v16 }
  0xa8   :  { %1240 = vmatmul.mubr.f32.vlgmr.msra.gmra.mrb[0].mxu0 %v133_v14 }
 0x17b   :  { %v1450_v41 = vpop.f32.mrb[0].mxu0 }
 0x17c   :  { %v560_v42 = vpop.f32.mrb[1].mxu0 }
 0x17d   :  { %571 = vadd.xlane.f32.xlu0 %v560_v42  ;;  %v574_v43 = vmul.f32 %v560_v42, %v560_v42 }
 0x17f   :  { %575 = vadd.xlane.f32.xlu1 %v574_v43 }
 0x20a   :  { %v572_v45 = vpop.xlane.xlu0 %571 }
 0x20b   :  { %v573_v46 = vmul.f32 0.0625, %v572_v45 }
 0x20c   :  { %v576_v47 = vpop.xlane.xlu1 %575 }
 0x20d   :  { %v578_v48 = vmul.f32 %v573_v46, %v573_v46  ;;  %v577_v49 = vmul.f32 0.0625, %v576_v47  ;;  %v1386_v47 = vmov 4  }
 0x20f   :  { %v579_v50 = vsub.f32 %v577_v49, %v578_v48 }
 0x211   :  { %v580_v51 = vmax.f32 %v579_v50, 0.0 }
 0x213   :  { %v581_v52 = vadd.f32 1e-05, %v580_v51  ;;  %v1387_v51 = vmov 3  }
 0x215   :  { %1374 = vrsqrt.f32 %v581_v52 }
 0x21f   :  { %v1375_v54 = vpop.eup %1374 }
 0x220   :  { %v583_v55 = vmul.f32 %v1375_v54, %v1455_v53 }
 0x222   :  { %v584_v56 = vmul.f32 %v583_v55, %v573_v46 }
 0x224   :  { %586 = vrot.lane.b32.xlu1 %v584_v56, %s1378_s22 }
 0x228   :  { %592 = vperm.xlu1 %1368, %v583_v55  }
 0x22c   :  { %1369 = vset.pattern.permute.xlu1 %v1380_v57 }
 0x296   :  { %v587_v58 = vpop.permute.xlu1 %586 }
 0x297   :  { %v589_v59 = vsub.f32 %v1455_v53, %v587_v58 }
 0x299   :  { %598 = vperm.xlu1 %1369, %v589_v59  }
 0x29d   :  { %1372 = vset.pattern.permute.xlu1 %v1386_v47 }
 0x2a7   :  { %v593_v60 = vpop.permute.xlu1 %592 }
 0x2a8   :  { %v595_v62 = vmul.f32 %v593_v60, %v560_v42 }
 0x318   :  { %v599_v63 = vpop.permute.xlu1 %598 }
 0x319   :  { %v601_v0 = vadd.f32 %v599_v63, %v595_v62 }
 0x31b   :  { %v602_v1 = vmax.f32 %v601_v0, 0.0 }
 0x31d   :  { %v605_v3 = vsel %vm38_vm2, %v602_v1, 0.0 }
 0x31e   :  { %606 = vrot.lane.b32.xlu1 %v605_v3, %s1378_s22  ;;  %v622_v7 = vand.u32 4294901760, %v605_v3 }
 0x320   :  { %v705_v9 = vsub.f32 %v605_v3, %v622_v7 }
 0x322   :  { %609 = vrot.lane.b32.xlu1 %v605_v3, %s1384_s4  ;;  %v706_v16 = vand.u32 4294901760, %v705_v9 }
 0x324   :  { %v707_v25 = vsub.f32 %v705_v9, %v706_v16 }
 0x326   :  { %v708_v28 = vand.u32 4294901760, %v707_v25 }
 0x390   :  { %v607_v11 = vpop.permute.xlu1 %606 }
 0x391   :  { %v608_v13 = vsel %vm1441_vm1, 0.0, %v607_v11 }
 0x392   :  { %v619_v14 = vand.u32 4294901760, %v608_v13 }
 0x394   :  { %v1321_v18 = vpack.c.bf16 %v622_v7, %v619_v14  ;;  %v698_v20 = vsub.f32 %v608_v13, %v619_v14  ;;  %v610_v21 = vpop.permute.xlu1 %609 }
 0x395   :  { %v613_v22 = vsel %vm37_vm6, 0.0, %v610_v21 }
 0x396   :  { %v699_v23 = vand.u32 4294901760, %v698_v20  ;;  %v625_v24 = vand.u32 4294901760, %v613_v22  ;;  %1322 = vmatpush3.bf16.msra.mxu1 %v1321_v18  ;;  %v1327_v32 = vpack.c.bf16 %v705_v9, %v698_v20 }
 0x397   :  { %1246 = vmatprep.subr.mxu1 %v1383_v2 }
 0x398   :  { %v700_v15 = vsub.f32 %v698_v20, %v699_v23  ;;  %v712_v26 = vsub.f32 %v613_v22, %v625_v24  ;;  %v1333_v33 = vpack.c.bf16 %v706_v16, %v699_v23 }
 0x39a   :  { %v701_v27 = vand.u32 4294901760, %v700_v15  ;;  %v713_v19 = vand.u32 4294901760, %v712_v26  ;;  %1247 = vmatpush3.msra.mxu1 %v625_v24 }
 0x39b   :  { %1249 = vmatmul.mubr.f32.vlgmr.msra.gmra.mrb[0].mxu1 %v690_v12  ;;  %1323 = vmatprep.subr.bf16.mxu1 %v1381_v61 }
 0x39c   :  { %v714_v29 = vsub.f32 %v712_v26, %v713_v19  ;;  %v1324_v30 = vpack.c.bf16 %v708_v28, %v701_v27  ;;  %1257 = vmatprep.mubr.msk.f32.mxu1 %vm1382_vm3, %v1383_v2 }
 0x39e   :  { %1325 = vmatpush3.bf16.msra.mxu1 %v1324_v30  ;;  %v715_v31 = vand.u32 4294901760, %v714_v29 }
 0x39f   :  { %1255 = vmatprep.subr.mxu1 %v1383_v2 }
 0x3a2   :  { %1256 = vmatpush3.msra.mxu1 %v715_v31 }
 0x3a3   :  { %1258 = vmatmul.mubr.f32.vlgmr.msra.gmra.mrb[0].mxu1 %v1469_v6  ;;  %1326 = vmatprep.subr.bf16.mxu1 %v1381_v61 }
 0x3a4   :  { %1328 = vmatpush3.bf16.msra.mxu1 %v1327_v32  ;;  %1266 = vmatprep.mubr.msk.f32.mxu1 %vm1382_vm3, %v1383_v2 }
 0x3a5   :  { %1264 = vmatprep.subr.mxu1 %v1383_v2 }
 0x3a8   :  { %1265 = vmatpush3.msra.mxu1 %v712_v26 }
 0x3a9   :  { %1329 = vmatprep.subr.bf16.mxu1 %v1381_v61 }
 0x3ab   :  { %1267 = vmatmul.mubr.f32.vlgmr.msra.gmra.mrb[0].mxu1 %v687_v8 }
 0x3ac   :  { %1331 = vmatpush3.bf16.msra.mxu1 %v1321_v18  ;;  %1275 = vmatprep.mubr.msk.f32.mxu1 %vm1382_vm3, %v1383_v2 }
 0x3ad   :  { %1273 = vmatprep.subr.mxu1 %v1383_v2 }
 0x3b0   :  { %1274 = vmatpush3.msra.mxu1 %v625_v24 }
 0x3b1   :  { %1332 = vmatprep.subr.bf16.mxu1 %v1381_v61 }
 0x3b3   :  { %1276 = vmatmul.mubr.f32.vlgmr.msra.gmra.mrb[0].mxu1 %v688_v10 }
 0x3b4   :  { %1334 = vmatpush3.bf16.msra.mxu1 %v1333_v33  ;;  %1284 = vmatprep.mubr.msk.f32.mxu1 %vm1382_vm3, %v1383_v2 }
 0x3b5   :  { %1282 = vmatprep.subr.mxu1 %v1383_v2 }
 0x3b8   :  { %1283 = vmatpush3.msra.mxu1 %v713_v19 }
 0x3b9   :  { %1335 = vmatprep.subr.bf16.mxu1 %v1381_v61 }
 0x3bb   :  { %1285 = vmatmul.mubr.f32.vlgmr.msra.gmra.mrb[0].mxu1 %v1469_v6 }
 0x3bc   :  { %1337 = vmatpush3.bf16.msra.mxu1 %v1321_v18  ;;  %1293 = vmatprep.mubr.msk.f32.mxu1 %vm1382_vm3, %v1383_v2 }
 0x3bd   :  { %1291 = vmatprep.subr.mxu1 %v1383_v2 }
 0x3c0   :  { %1292 = vmatpush3.msra.mxu1 %v625_v24 }
 0x3c3   :  { %1294 = vmatmul.mubr.f32.vlgmr.msra.gmra.mrb[0].mxu1 %v1469_v6 }
 0x496   :  { %v1086_v34 = vpop.f32.mrb[0].mxu1 }
 0x497   :  { %1090 = vadd.xlane.f32.xlu0 %v1086_v34  ;;  %v1295_v35 = vpop.f32.mrb[1].mxu1  ;;  %v1093_v36 = vmul.f32 %v1086_v34, %v1086_v34 }
 0x499   :  { %1094 = vadd.xlane.f32.xlu1 %v1093_v36 }
 0x4aa   :  { %1124 = vperm.xlu1 %1372, %v1455_v53  }
 0x524   :  { %v1091_v38 = vpop.xlane.xlu0 %1090 }
 0x525   :  { %v1092_v39 = vmul.f32 0.0625, %v1091_v38 }
 0x526   :  { %v1095_v40 = vpop.xlane.xlu1 %1094 }
 0x527   :  { %v1097_v42 = vmul.f32 %v1092_v39, %v1092_v39  ;;  %v1096_v43 = vmul.f32 0.0625, %v1095_v40 }
 0x529   :  { %v1098_v44 = vsub.f32 %v1096_v43, %v1097_v42 }
 0x52a   :  { %v1125_v59 = vpop.permute.xlu1 %1124 }
 0x52b   :  { %v1099_v45 = vmax.f32 %v1098_v44, 0.0 }
 0x52d   :  { %v1100_v46 = vadd.f32 1e-05, %v1099_v45 }
 0x52f   :  { %1376 = vrsqrt.f32 %v1100_v46 }
 0x539   :  { %v1377_v48 = vpop.eup %1376 }
 0x53a   :  { %v1102_v49 = vmul.f32 %v1377_v48, %v1455_v53 }
 0x53c   :  { %v1103_v50 = vmul.f32 %v1102_v49, %v1092_v39 }
 0x53e   :  { %1105 = vrot.lane.b32.xlu0 %v1103_v50, %s1378_s22 }
 0x542   :  { %1111 = vperm.xlu0 %1370, %v1102_v49  }
 0x546   :  { %1371 = vset.pattern.permute.xlu0 %v1387_v51 }
 0x5b0   :  { %v1106_v52 = vpop.permute.xlu0 %1105 }
 0x5b1   :  { %v1108_v54 = vsub.f32 %v1455_v53, %v1106_v52 }
 0x5b3   :  { %1117 = vperm.xlu0 %1371, %v1108_v54  }
 0x5b7   :  { %1373 = vset.pattern.permute.xlu0 %v1386_v47 }
 0x5c1   :  { %v1112_v55 = vpop.permute.xlu0 %1111 }
 0x5c2   :  { %v1114_v56 = vmul.f32 %v1112_v55, %v1086_v34 }
 0x632   :  { %v1118_v57 = vpop.permute.xlu0 %1117 }
 0x633   :  { %v1120_v58 = vadd.f32 %v1118_v57, %v1114_v56 }
 0x635   :  { %v1121_v60 = vadd.f32 %v1450_v41, %v1120_v58 }
 0x637   :  { %v1127_v61 = vadd.f32 %v1125_v59, %v1121_v60 }
 0x639   :  { %v1128_v62 = vmax.f32 %v1127_v61, 0.0 }
 0x63b   :  { %1129 = vst [vmem:[%s1514_s5] sm:$0xff] %v1128_v62 }

</bundles_post_ra>
